<compile_context>
chip_gen: v5e
topology: v5e:2x2
jax: 0.10.0
libtpu: 0.0.40
codegen_flags: <defaults>
</compile_context>

<pallas_src>
import functools

import jax
import jax.numpy as jnp
from jax.experimental import pallas as pl
from jax.experimental.pallas import tpu as pltpu


# ---------------------------------------------------------------------------
# Fused forward kernel: one row-tile of the batch per grid step.
#   x_ref:   (tm, 5)
#   w1_ref:  (5, 32)     encoder Linear(5,32)
#   w23_ref: (32, 32)    fused  Linear(32,5) @ Linear(5,32)
#   w4_ref:  (32, 5)     decoder Linear(32,5)
#   b_ref:   (3, 32)     row0=b1, row1=b23, row2[:5]=b4
# ---------------------------------------------------------------------------
def _occupancy_ae_kernel(x_ref, w1_ref, w23_ref, w4_ref, b_ref, o_ref):
    x = x_ref[...].astype(jnp.float32)

    b1 = b_ref[0:1, :]          # (1, 32)
    b23 = b_ref[1:2, :]         # (1, 32)
    b4 = b_ref[2:3, 0:5]        # (1, 5)

    # encoder first Linear + ReLU
    h = jnp.dot(x, w1_ref[...], preferred_element_type=jnp.float32) + b1
    h = jnp.maximum(h, 0.0)                                     # ReLU (VPU)

    # fused (encoder Linear(32,5) -> decoder Linear(5,32)) + ReLU
    g = jnp.dot(h, w23_ref[...], preferred_element_type=jnp.float32) + b23
    g = jnp.maximum(g, 0.0)

    # decoder final Linear
    dec = jnp.dot(g, w4_ref[...], preferred_element_type=jnp.float32) + b4

    o_ref[...] = dec.astype(o_ref.dtype)


# ---------------------------------------------------------------------------
# Tile selection: adaptive to batch size.
#  - tiny batch  -> single grid step (minimize per-step overhead)
#  - large batch -> ~1024-row tiles, and keep >= 2 grid steps so v7x megacore
#    can shard the "parallel" batch axis across both TensorCores.
# ---------------------------------------------------------------------------
def _round_up(n, m):
    return ((n + m - 1) // m) * m


def _pick_tm(B, target=1024, max_tm=2048):
    b8 = _round_up(B, 8)
    if b8 <= 256:                       # small-batch fallback: one grid step
        return b8
    tm = min(target, max_tm, b8)
    tm = _round_up(tm, 8)
    if (b8 + tm - 1) // tm < 2:         # prefer >= 2 steps (v7x: 2 TCs/chip)
        tm = _round_up((b8 + 1) // 2, 8)
    return tm


# ---------------------------------------------------------------------------
# Wrapper: grid over batch row-tiles; parameters broadcast to every step.
# ---------------------------------------------------------------------------
def occupancy_ae_forward(x, params, *, tm_target=1024):
    B, F = x.shape
    assert F == 5, "occupancy_ae expects 5 input features"

    w1, b1 = params["w1"], params["b1"]
    w2, b2 = params["w2"], params["b2"]
    w3, b3 = params["w3"], params["b3"]
    w4, b4 = params["w4"], params["b4"]

    # Algebraic fusion of the two middle Linears (no ReLU between them):
    #   (h @ w2 + b2) @ w3 + b3 == h @ (w2 @ w3) + (b2 @ w3 + b3)
    w23 = jnp.dot(w2, w3)                       # (32, 32)
    b23 = jnp.dot(b2, w3) + b3                  # (32,)

    # Pack all biases into one (3, 32) VMEM block.
    biases = jnp.zeros((3, 32), jnp.float32)
    biases = biases.at[0, :].set(b1).at[1, :].set(b23).at[2, :5].set(b4)

    # Adaptive row tile, pad batch to a multiple of it (sliced off afterwards).
    tm = _pick_tm(B, target=tm_target)
    B_pad = _round_up(B, tm)
    if B_pad != B:
        x = jnp.pad(x, ((0, B_pad - B), (0, 0)))

    bcast = lambda i: (0, 0)                    # params: same block every step

    out = pl.pallas_call(
        _occupancy_ae_kernel,
        out_shape=jax.ShapeDtypeStruct((B_pad, 5), jnp.float32),
        grid_spec=pltpu.PrefetchScalarGridSpec(
            num_scalar_prefetch=0,
            grid=(B_pad // tm,),
            in_specs=[
                pl.BlockSpec((tm, 5), lambda i: (i, 0)),   # x row tile
                pl.BlockSpec((5, 32), bcast),              # w1
                pl.BlockSpec((32, 32), bcast),             # w23 (fused)
                pl.BlockSpec((32, 5), bcast),              # w4
                pl.BlockSpec((3, 32), bcast),              # stacked biases
            ],
            out_specs=pl.BlockSpec((tm, 5), lambda i: (i, 0)),
        ),
        compiler_params=pltpu.CompilerParams(
            dimension_semantics=("parallel",),
            vmem_limit_bytes=32 * 1024 * 1024,
        ),
    )(x, w1, w23, w4, biases)

    return out[:B]
    # TODO(synk): if the surrounding pipeline can supply feature-major (5, B)
    # data, a transposed kernel (batch on the lane axis) removes the masked
    # partial stores on the 5-wide output; not done here to keep the PyTorch
    # (B, 5) layout without an extra wrapper-side transpose pass.


# ---------------------------------------------------------------------------
# Parameter init (PyTorch nn.Linear default: U(-1/sqrt(fan_in), +1/sqrt(fan_in)))
# Weights stored as (in, out) so the kernel computes x @ W + b (== PyTorch).
# ---------------------------------------------------------------------------
def init_params(key):
    def linear(key, fan_in, fan_out):
        kw, kb = jax.random.split(key)
        bound = 1.0 / jnp.sqrt(float(fan_in))
        w = jax.random.uniform(kw, (fan_in, fan_out), jnp.float32,
                               minval=-bound, maxval=bound)
        b = jax.random.uniform(kb, (fan_out,), jnp.float32,
                               minval=-bound, maxval=bound)
        return w, b

    k1, k2, k3, k4 = jax.random.split(key, 4)
    w1, b1 = linear(k1, 5, 32)   # encoder[0]
    w2, b2 = linear(k2, 32, 5)   # encoder[2]
    w3, b3 = linear(k3, 5, 32)   # decoder[0]
    w4, b4 = linear(k4, 32, 5)   # decoder[2]
    return {"w1": w1, "b1": b1, "w2": w2, "b2": b2,
            "w3": w3, "b3": b3, "w4": w4, "b4": b4}


# Plain-JAX reference (unfused, same op order as PyTorch) for cross-check.
def _reference_forward(x, p):
    h = jnp.maximum(x @ p["w1"] + p["b1"], 0.0)
    enc = h @ p["w2"] + p["b2"]
    g = jnp.maximum(enc @ p["w3"] + p["b3"], 0.0)
    return g @ p["w4"] + p["b4"]


@functools.partial(jax.jit, static_argnames=("tm_target",))
def forward_jit(x, params, tm_target=1024):
    return occupancy_ae_forward(x, params, tm_target=tm_target)


if __name__ == "__main__":
    key = jax.random.PRNGKey(0)
    k_x, k_x2, k_p = jax.random.split(key, 3)

    params = init_params(k_p)

    # Case 1: small batch (single-step grid / small-batch path).
    B1 = 64
    x1 = jax.random.normal(k_x, (B1, 5), jnp.float32)
    out1 = forward_jit(x1, params)
    jax.block_until_ready(out1)
    assert out1.shape == (B1, 5)
    ref1 = _reference_forward(x1, params)
    assert jnp.allclose(out1, ref1, atol=1e-4, rtol=1e-4), (
        float(jnp.max(jnp.abs(out1 - ref1))))

    # Case 2: non-multiple batch exercising padding + multi-step grid.
    B2 = 300
    x2 = jax.random.normal(k_x2, (B2, 5), jnp.float32)
    out2 = forward_jit(x2, params)
    jax.block_until_ready(out2)
    assert out2.shape == (B2, 5)
    ref2 = _reference_forward(x2, params)
    assert jnp.allclose(out2, ref2, atol=1e-4, rtol=1e-4), (
        float(jnp.max(jnp.abs(out2 - ref2))))

    print("KERNEL_OK")
</pallas_src>

<mosaic_0001>
module attributes {stable_mosaic.version = 11 : i64} {
  func.func @_occupancy_ae_kernel(%arg0: i32, %arg1: memref<64x5xf32, #tpu.memory_space<vmem>>, %arg2: memref<5x32xf32, #tpu.memory_space<vmem>>, %arg3: memref<32x32xf32, #tpu.memory_space<vmem>>, %arg4: memref<32x5xf32, #tpu.memory_space<vmem>>, %arg5: memref<3x32xf32, #tpu.memory_space<vmem>>, %arg6: memref<64x5xf32, #tpu.memory_space<vmem>>) attributes {dimension_semantics = [#tpu.dimension_semantics<parallel>], iteration_bounds = array<i64: 1>, scalar_prefetch = 0 : i64, scratch_operands = 0 : i64, tpu.core_type = #tpu.core_type<tc>, window_params = [{transform_indices = @transform_0, window_bounds = array<i64: 64, 5>}, {pipeline_mode = #tpu.pipeline_mode<synchronous>, transform_indices = @transform_1, window_bounds = array<i64: 5, 32>}, {pipeline_mode = #tpu.pipeline_mode<synchronous>, transform_indices = @transform_2, window_bounds = array<i64: 32, 32>}, {pipeline_mode = #tpu.pipeline_mode<synchronous>, transform_indices = @transform_3, window_bounds = array<i64: 32, 5>}, {pipeline_mode = #tpu.pipeline_mode<synchronous>, transform_indices = @transform_4, window_bounds = array<i64: 3, 32>}, {transform_indices = @transform_5, window_bounds = array<i64: 64, 5>}]} {
    %c0 = arith.constant 0 : index
    %c0_0 = arith.constant 0 : index
    %0 = vector.load %arg1[%c0, %c0_0] : memref<64x5xf32, #tpu.memory_space<vmem>>, vector<64x5xf32>
    %c0_1 = arith.constant 0 : index
    %c0_2 = arith.constant 0 : index
    %1 = vector.load %arg5[%c0_1, %c0_2] : memref<3x32xf32, #tpu.memory_space<vmem>>, vector<1x32xf32>
    %c1 = arith.constant 1 : index
    %c0_3 = arith.constant 0 : index
    %2 = vector.load %arg5[%c1, %c0_3] : memref<3x32xf32, #tpu.memory_space<vmem>>, vector<1x32xf32>
    %c2 = arith.constant 2 : index
    %c0_4 = arith.constant 0 : index
    %3 = vector.load %arg5[%c2, %c0_4] : memref<3x32xf32, #tpu.memory_space<vmem>>, vector<1x5xf32>
    %c0_5 = arith.constant 0 : index
    %c0_6 = arith.constant 0 : index
    %4 = vector.load %arg2[%c0_5, %c0_6] : memref<5x32xf32, #tpu.memory_space<vmem>>, vector<5x32xf32>
    %cst = arith.constant dense<0.000000e+00> : vector<64x32xf32>
    %5 = tpu.matmul %0, %4, %cst {dimension_numbers = #tpu.dot_dimension_numbers<[1], [0], [0], [1], [0, 0, 1, 1], [], []>} : vector<64x5xf32>, vector<5x32xf32>, vector<64x32xf32> -> vector<64x32xf32>
    %6 = vector.broadcast %1 : vector<1x32xf32> to vector<64x32xf32>
    %7 = arith.addf %5, %6 : vector<64x32xf32>
    %cst_7 = arith.constant 0.000000e+00 : f32
    %8 = vector.broadcast %cst_7 : f32 to vector<64x32xf32>
    %9 = arith.maximumf %7, %8 : vector<64x32xf32>
    %c0_8 = arith.constant 0 : index
    %c0_9 = arith.constant 0 : index
    %10 = vector.load %arg3[%c0_8, %c0_9] : memref<32x32xf32, #tpu.memory_space<vmem>>, vector<32x32xf32>
    %cst_10 = arith.constant dense<0.000000e+00> : vector<64x32xf32>
    %11 = tpu.matmul %9, %10, %cst_10 {dimension_numbers = #tpu.dot_dimension_numbers<[1], [0], [0], [1], [0, 0, 1, 1], [], []>} : vector<64x32xf32>, vector<32x32xf32>, vector<64x32xf32> -> vector<64x32xf32>
    %12 = vector.broadcast %2 : vector<1x32xf32> to vector<64x32xf32>
    %13 = arith.addf %11, %12 : vector<64x32xf32>
    %cst_11 = arith.constant 0.000000e+00 : f32
    %14 = vector.broadcast %cst_11 : f32 to vector<64x32xf32>
    %15 = arith.maximumf %13, %14 : vector<64x32xf32>
    %c0_12 = arith.constant 0 : index
    %c0_13 = arith.constant 0 : index
    %16 = vector.load %arg4[%c0_12, %c0_13] : memref<32x5xf32, #tpu.memory_space<vmem>>, vector<32x5xf32>
    %cst_14 = arith.constant dense<0.000000e+00> : vector<64x5xf32>
    %17 = tpu.matmul %15, %16, %cst_14 {dimension_numbers = #tpu.dot_dimension_numbers<[1], [0], [0], [1], [0, 0, 1, 1], [], []>} : vector<64x32xf32>, vector<32x5xf32>, vector<64x5xf32> -> vector<64x5xf32>
    %18 = vector.broadcast %3 : vector<1x5xf32> to vector<64x5xf32>
    %19 = arith.addf %17, %18 : vector<64x5xf32>
    %c0_15 = arith.constant 0 : index
    %c0_16 = arith.constant 0 : index
    %20 = vector.load %arg6[%c0_15, %c0_16] : memref<64x5xf32, #tpu.memory_space<vmem>>, vector<64x5xf32>
    tpu.vector_store %arg6[%c0_15, %c0_16], %19 {strides = array<i32>} : memref<64x5xf32, #tpu.memory_space<vmem>>, vector<64x5xf32>,
    return
  }
  func.func @transform_0(%arg0: i32) -> (i32, i32) {
    %c0_i32 = arith.constant 0 : i32
    %c0_i32_0 = arith.constant 0 : i32
    return %arg0, %c0_i32 : i32, i32
  }
  func.func @transform_1(%arg0: i32) -> (i32, i32) {
    %c0_i32 = arith.constant 0 : i32
    %c0_i32_0 = arith.constant 0 : i32
    %c0_i32_1 = arith.constant 0 : i32
    return %c0_i32, %c0_i32_0 : i32, i32
  }
  func.func @transform_2(%arg0: i32) -> (i32, i32) {
    %c0_i32 = arith.constant 0 : i32
    %c0_i32_0 = arith.constant 0 : i32
    %c0_i32_1 = arith.constant 0 : i32
    return %c0_i32, %c0_i32_0 : i32, i32
  }
  func.func @transform_3(%arg0: i32) -> (i32, i32) {
    %c0_i32 = arith.constant 0 : i32
    %c0_i32_0 = arith.constant 0 : i32
    %c0_i32_1 = arith.constant 0 : i32
    return %c0_i32, %c0_i32_0 : i32, i32
  }
  func.func @transform_4(%arg0: i32) -> (i32, i32) {
    %c0_i32 = arith.constant 0 : i32
    %c0_i32_0 = arith.constant 0 : i32
    %c0_i32_1 = arith.constant 0 : i32
    return %c0_i32, %c0_i32_0 : i32, i32
  }
  func.func @transform_5(%arg0: i32) -> (i32, i32) {
    %c0_i32 = arith.constant 0 : i32
    %c0_i32_0 = arith.constant 0 : i32
    return %arg0, %c0_i32 : i32, i32
  }
}

</mosaic_0001>

<bundles_post_ra>
// kernel: forward_jit.1
= control target key start
LH: loop header
LB: loop body
LE: loop exit
PB: predicated region body
PF: predicated region fallthrough
CT: control target
= control target key end

     0   :  { %vm58_vm0 = vcmask 1044480   ;;  %vm33_vm1 = vcmask 39936   ;;  %vm116_vm2 = vcmask 261120   ;;  %s455_s1 = inlined_call_operand.vmem [shape: f32[5,32], index: 1, kind: input, shape index: {}]   ;;  %s456_s0 = inlined_call_operand.vmem [shape: f32[64,5], index: 0, kind: input, shape index: {}]   ;;  %s457_s4 = inlined_call_operand.vmem [shape: f32[3,32], index: 4, kind: input, shape index: {}]   ;;  %s458_s2 = inlined_call_operand.vmem [shape: f32[32,32], index: 2, kind: input, shape index: {}]   ;;  %s459_s3 = inlined_call_operand.vmem [shape: f32[32,5], index: 3, kind: input, shape index: {}]   ;;  %s460_s5 = inlined_call_operand.vmem [shape: f32[64,5], index: 5, kind: output, shape index: {}]  }
   0x1   :  { %v31_v0 = vld [vmem:[%s455_s1] sm:$0x1f]  ;;  %v21_v2 = vld [vmem:[%s456_s0 + $0x8] sm:$0xff]  ;;  %v22_v3 = vld [vmem:[%s456_s0 + $0x10] sm:$0xff] }
   0x2   :  { %v20_v1 = vld [vmem:[%s456_s0] sm:$0xff]  ;;  %272 = vmatpush.msk.msra.mxu0 %vm58_vm0, %v31_v0  ;;  %297 = vmatpush.msk.msra.mxu3 %vm58_vm0, %v31_v0  ;;  %v27_v4 = vld [vmem:[%s456_s0 + $0x38] sm:$0xff]  ;;  %v25_v8 = vld [vmem:[%s456_s0 + $0x28] sm:$0xff] }
   0x3   :  { %273 = vmatmul.msk.f32.vlgmr.msra.gmra.mxu0 %vm33_vm1, %v20_v1  ;;  %v114_v5 = vld [vmem:[%s458_s2 + $0x18] sm:$0xff]  ;;  %280 = vmatmul.msk.f32.vlgmr.msra.gmra.mxu3 %vm33_vm1, %v27_v4  ;;  %v24_v7 = vld [vmem:[%s456_s0 + $0x20] sm:$0xff]  ;;  %v26_v9 = vld [vmem:[%s456_s0 + $0x30] sm:$0xff] }
   0x4   :  { %153 = vmatpush.msra.mxu1 %v114_v5  ;;  %298 = vmatpush.msrb.mxu3 %v114_v5  ;;  %v23_v6 = vld [vmem:[%s456_s0 + $0x18] sm:$0xff]  ;;  %v113_v10 = vld [vmem:[%s458_s2 + $0x10] sm:$0xff]  ;;  %v112_v11 = vld [vmem:[%s458_s2 + $0x8] sm:$0xff] }
   0x5   :  { %v111_v12 = vld [vmem:[%s458_s2] sm:$0xff]  ;;  %v193_v26 = vld [vmem:[%s459_s3 + $0x18] sm:$0xff]  ;;  %v192_v39 = vld [vmem:[%s459_s3 + $0x10] sm:$0xff] }
   0x6   :  { %154 = vmatpush.msra.mxu1 %v113_v10  ;;  %299 = vmatpush.msrb.mxu3 %v113_v10  ;;  %v306_v13 = vld [vmem:[%s457_s4] ss:$0 sm:$0xff]  ;;  %v191_v40 = vld [vmem:[%s459_s3 + $0x8] sm:$0xff]  ;;  %v307_v42 = vld [vmem:[%s457_s4 + $0x1] ss:$0 sm:$0xff] }
   0x7   :  { %231 = vmatpush.msra.mxu2 %v193_v26  ;;  %v190_v41 = vld [vmem:[%s459_s3] sm:$0xff] }
   0x8   :  { %155 = vmatpush.msra.mxu1 %v112_v11  ;;  %300 = vmatpush.msrb.mxu3 %v112_v11 }
   0x9   :  { %232 = vmatpush.msra.mxu2 %v192_v39 }
   0xa   :  { %156 = vmatpush.msra.mxu1 %v111_v12  ;;  %301 = vmatpush.msrb.mxu3 %v111_v12 }
   0xb   :  { %274 = vmatmul.msk.f32.gmra.mxu0 %vm33_vm1, %v21_v2  ;;  %233 = vmatpush.msra.mxu2 %v191_v40 }
   0xc   :  { %302 = vmatpush.msra.mxu3 %v193_v26 }
   0xd   :  { %234 = vmatpush.msra.mxu2 %v190_v41 }
   0xe   :  { %303 = vmatpush.msra.mxu3 %v192_v39 }
  0x10   :  { %304 = vmatpush.msra.mxu3 %v191_v40 }
  0x12   :  { %305 = vmatpush.msra.mxu3 %v190_v41 }
  0x13   :  { %275 = vmatmul.msk.f32.gmra.mxu0 %vm33_vm1, %v22_v3  ;;  %v308_v3 = vld [vmem:[%s457_s4 + $0x2] ss:$0 sm:$0xff] }
  0x1b   :  { %276 = vmatmul.msk.f32.gmra.mxu0 %vm33_vm1, %v23_v6 }
  0x23   :  { %277 = vmatmul.msk.f32.gmra.mxu0 %vm33_vm1, %v24_v7 }
  0x2b   :  { %278 = vmatmul.msk.f32.gmra.mxu0 %vm33_vm1, %v25_v8 }
  0x33   :  { %279 = vmatmul.msk.f32.gmra.mxu0 %vm33_vm1, %v26_v9 }
  0x80   :  { %v79_v14 = vpop.f32.mrf.mxu0 }
  0x81   :  { %v80_v15 = vadd.f32 %v306_v13, %v79_v14 }
  0x83   :  { %v103_v16 = vmax.f32 %v80_v15, 0.0 }
  0x85   :  { %281 = vmatmul.msk.f32.vlgmr.msra.gmra.mxu1 %vm116_vm2, %v103_v16 }
  0x86   :  { %v100_v35 = vpop.f32.mrf.mxu3 }
  0x87   :  { %v101_v37 = vadd.f32 %v306_v13, %v100_v35 }
  0x88   :  { %v82_v17 = vpop.f32.mrf.mxu0 }
  0x89   :  { %v83_v18 = vadd.f32 %v306_v13, %v82_v17  ;;  %v110_v38 = vmax.f32 %v101_v37, 0.0 }
  0x8b   :  { %v104_v19 = vmax.f32 %v83_v18, 0.0 }
  0x8d   :  { %282 = vmatmul.msk.f32.gmra.mxu1 %vm116_vm2, %v104_v19 }
  0x90   :  { %v85_v20 = vpop.f32.mrf.mxu0 }
  0x91   :  { %v86_v21 = vadd.f32 %v306_v13, %v85_v20 }
  0x93   :  { %v105_v22 = vmax.f32 %v86_v21, 0.0 }
  0x95   :  { %283 = vmatmul.msk.f32.gmra.mxu1 %vm116_vm2, %v105_v22 }
  0x98   :  { %v88_v23 = vpop.f32.mrf.mxu0 }
  0x99   :  { %v89_v24 = vadd.f32 %v306_v13, %v88_v23 }
  0x9b   :  { %v106_v25 = vmax.f32 %v89_v24, 0.0 }
  0x9d   :  { %284 = vmatmul.msk.f32.gmra.mxu1 %vm116_vm2, %v106_v25 }
  0xa0   :  { %v91_v27 = vpop.f32.mrf.mxu0 }
  0xa1   :  { %v92_v28 = vadd.f32 %v306_v13, %v91_v27 }
  0xa3   :  { %v107_v29 = vmax.f32 %v92_v28, 0.0 }
  0xa5   :  { %285 = vmatmul.msk.f32.gmra.mxu1 %vm116_vm2, %v107_v29 }
  0xa8   :  { %v94_v30 = vpop.f32.mrf.mxu0 }
  0xa9   :  { %v95_v31 = vadd.f32 %v306_v13, %v94_v30 }
  0xab   :  { %v108_v32 = vmax.f32 %v95_v31, 0.0 }
  0xad   :  { %286 = vmatmul.msk.f32.gmra.mxu1 %vm116_vm2, %v108_v32 }
  0xb0   :  { %v97_v33 = vpop.f32.mrf.mxu0 }
  0xb1   :  { %v98_v34 = vadd.f32 %v306_v13, %v97_v33 }
  0xb3   :  { %v109_v36 = vmax.f32 %v98_v34, 0.0 }
  0xb5   :  { %287 = vmatmul.msk.f32.vlgmr.msrb.gmra.mxu3 %vm116_vm2, %v109_v36 }
  0xbd   :  { %288 = vmatmul.msk.f32.gmra.mxu3 %vm116_vm2, %v110_v38 }
 0x102   :  { %v158_v43 = vpop.f32.mrf.mxu1 }
 0x103   :  { %v159_v44 = vadd.f32 %v307_v42, %v158_v43 }
 0x105   :  { %v182_v45 = vmax.f32 %v159_v44, 0.0 }
 0x107   :  { %289 = vmatmul.msk.f32.vlgmr.msra.gmra.mxu2 %vm116_vm2, %v182_v45 }
 0x10a   :  { %v161_v46 = vpop.f32.mrf.mxu1 }
 0x10b   :  { %v162_v47 = vadd.f32 %v307_v42, %v161_v46 }
 0x10d   :  { %v183_v48 = vmax.f32 %v162_v47, 0.0 }
 0x10f   :  { %290 = vmatmul.msk.f32.gmra.mxu2 %vm116_vm2, %v183_v48 }
 0x112   :  { %v164_v49 = vpop.f32.mrf.mxu1 }
 0x113   :  { %v165_v50 = vadd.f32 %v307_v42, %v164_v49 }
 0x115   :  { %v184_v51 = vmax.f32 %v165_v50, 0.0 }
 0x117   :  { %291 = vmatmul.msk.f32.gmra.mxu2 %vm116_vm2, %v184_v51 }
 0x11a   :  { %v167_v52 = vpop.f32.mrf.mxu1 }
 0x11b   :  { %v168_v53 = vadd.f32 %v307_v42, %v167_v52 }
 0x11d   :  { %v185_v54 = vmax.f32 %v168_v53, 0.0 }
 0x11f   :  { %292 = vmatmul.msk.f32.gmra.mxu2 %vm116_vm2, %v185_v54 }
 0x122   :  { %v170_v55 = vpop.f32.mrf.mxu1 }
 0x123   :  { %v171_v56 = vadd.f32 %v307_v42, %v170_v55 }
 0x125   :  { %v186_v57 = vmax.f32 %v171_v56, 0.0 }
 0x127   :  { %293 = vmatmul.msk.f32.gmra.mxu2 %vm116_vm2, %v186_v57 }
 0x12a   :  { %v173_v58 = vpop.f32.mrf.mxu1 }
 0x12b   :  { %v174_v59 = vadd.f32 %v307_v42, %v173_v58 }
 0x12d   :  { %v187_v60 = vmax.f32 %v174_v59, 0.0 }
 0x12f   :  { %294 = vmatmul.msk.f32.gmra.mxu2 %vm116_vm2, %v187_v60 }
 0x138   :  { %v176_v61 = vpop.f32.mrf.mxu3 }
 0x139   :  { %v177_v62 = vadd.f32 %v307_v42, %v176_v61 }
 0x13b   :  { %v188_v63 = vmax.f32 %v177_v62, 0.0 }
 0x13d   :  { %295 = vmatmul.msk.f32.vlgmr.msra.gmra.mxu3 %vm116_vm2, %v188_v63 }
 0x140   :  { %v179_v0 = vpop.f32.mrf.mxu3 }
 0x141   :  { %v180_v1 = vadd.f32 %v307_v42, %v179_v0 }
 0x143   :  { %v189_v2 = vmax.f32 %v180_v1, 0.0 }
 0x145   :  { %296 = vmatmul.msk.f32.gmra.mxu3 %vm116_vm2, %v189_v2 }
 0x18a   :  { %v236_v4 = vpop.f32.mrf.mxu2 }
 0x18b   :  { %v237_v5 = vadd.f32 %v308_v3, %v236_v4 }
 0x18d   :  { %260 = vst.msk [vmem:[%s460_s5] sm:$0xff] %vm33_vm1, %v237_v5 }
 0x192   :  { %v239_v6 = vpop.f32.mrf.mxu2 }
 0x193   :  { %v240_v7 = vadd.f32 %v308_v3, %v239_v6 }
 0x195   :  { %261 = vst.msk [vmem:[%s460_s5 + $0x8] sm:$0xff] %vm33_vm1, %v240_v7 }
 0x19a   :  { %v242_v8 = vpop.f32.mrf.mxu2 }
 0x19b   :  { %v243_v9 = vadd.f32 %v308_v3, %v242_v8 }
 0x19d   :  { %262 = vst.msk [vmem:[%s460_s5 + $0x10] sm:$0xff] %vm33_vm1, %v243_v9 }
 0x1a2   :  { %v245_v10 = vpop.f32.mrf.mxu2 }
 0x1a3   :  { %v246_v11 = vadd.f32 %v308_v3, %v245_v10 }
 0x1a5   :  { %263 = vst.msk [vmem:[%s460_s5 + $0x18] sm:$0xff] %vm33_vm1, %v246_v11 }
 0x1aa   :  { %v248_v12 = vpop.f32.mrf.mxu2 }
 0x1ab   :  { %v249_v13 = vadd.f32 %v308_v3, %v248_v12 }
 0x1ad   :  { %264 = vst.msk [vmem:[%s460_s5 + $0x20] sm:$0xff] %vm33_vm1, %v249_v13 }
 0x1b2   :  { %v251_v14 = vpop.f32.mrf.mxu2 }
 0x1b3   :  { %v252_v15 = vadd.f32 %v308_v3, %v251_v14 }
 0x1b5   :  { %265 = vst.msk [vmem:[%s460_s5 + $0x28] sm:$0xff] %vm33_vm1, %v252_v15 }
 0x1c0   :  { %v254_v16 = vpop.f32.mrf.mxu3 }
 0x1c1   :  { %v255_v17 = vadd.f32 %v308_v3, %v254_v16 }
 0x1c3   :  { %266 = vst.msk [vmem:[%s460_s5 + $0x30] sm:$0xff] %vm33_vm1, %v255_v17 }
 0x1c8   :  { %v257_v18 = vpop.f32.mrf.mxu3 }
 0x1c9   :  { %v258_v19 = vadd.f32 %v308_v3, %v257_v18 }
 0x1cb   :  { %267 = vst.msk [vmem:[%s460_s5 + $0x38] sm:$0xff] %vm33_vm1, %v258_v19 }

</bundles_post_ra>
